<compile_context>
chip_gen: v7x
topology: tpu7x:2x2x1
jax: 0.10.0
libtpu: 0.0.40
codegen_flags: <defaults>
</compile_context>

<pallas_src>
import functools

import jax
import jax.numpy as jnp
from jax.experimental import pallas as pl
from jax.experimental.pallas import tpu as pltpu

LANE = 128            # vreg lane width: feature dims padded to a multiple of this
MAX_TILE_B = 2048     # upper bound on the batch tile
_MiB = 1024 * 1024


def _round_up(x: int, m: int) -> int:
    return ((x + m - 1) // m) * m


def _cdiv(a: int, b: int) -> int:
    return (a + b - 1) // b


def _sublane_multiple(dtype) -> int:
    # second-to-last block-dim granularity: 8 for 4-byte, 16 for bf16, 32 for int8/fp8
    return max(8, 32 // jnp.dtype(dtype).itemsize)


def _vmem_capacity_bytes() -> int:
    try:
        cap = getattr(pltpu.get_tpu_info(), "vmem_capacity_bytes", None)
        if cap:
            return int(cap)
    except Exception:
        pass
    return 128 * _MiB   # v5e / v6e default; v7x (64 MiB) is picked up by the query


# --------------------------------------------------------------------------------------
# One-time parameter preparation (transpose + lane-pad + cast). Call at init, NOT per step.
# --------------------------------------------------------------------------------------
def prepare_params(W1, W2, b1=None, b2=None, compute_dtype=jnp.bfloat16):
    """W1: (H, D_in), W2: (O, H) -- PyTorch nn.Linear layouts.

    Weights are transposed, zero-padded to the 128-lane width and cast to
    `compute_dtype` (bf16 by default: MXU-native on v5e/v6e/v7x, with f32
    accumulation in-kernel). Pass compute_dtype=jnp.float32 for exact f32 weights.
    """
    W1 = jnp.asarray(W1)
    W2 = jnp.asarray(W2)
    H, D_in = W1.shape
    O, H2 = W2.shape
    assert H2 == H, "W1/W2 hidden dims disagree"
    Dp, Hp, Op = (_round_up(d, LANE) for d in (D_in, H, O))

    cdt = jnp.dtype(compute_dtype)
    w1t = jnp.zeros((Dp, Hp), cdt).at[:D_in, :H].set(W1.T.astype(cdt))
    w2t = jnp.zeros((Hp, Op), cdt).at[:H, :O].set(W2.T.astype(cdt))

    params = {"w1t": w1t, "w2t": w2t, "dims": (D_in, H, O), "compute_dtype": cdt.name}
    if b1 is not None:
        assert b2 is not None
        params["b1"] = jnp.zeros((1, Hp), jnp.float32).at[0, :H].set(
            jnp.asarray(b1, jnp.float32))
        params["b2"] = jnp.zeros((1, Op), jnp.float32).at[0, :O].set(
            jnp.asarray(b2, jnp.float32))
    return params


# --------------------------------------------------------------------------------------
# Kernels
# --------------------------------------------------------------------------------------
def _make_fused_kernel(use_bias, compute_dtype):
    """Both (padded) weight matrices VMEM-resident; one grid axis over the batch."""
    if use_bias:
        def kernel(x_ref, w1t_ref, w2t_ref, b1_ref, b2_ref, o_ref):
            x = x_ref[...].astype(compute_dtype)
            h = jnp.dot(x, w1t_ref[...], preferred_element_type=jnp.float32)
            h = (h + b1_ref[...]).astype(compute_dtype)       # bias add in f32 (VPU)
            y = jnp.dot(h, w2t_ref[...], preferred_element_type=jnp.float32)
            o_ref[...] = (y + b2_ref[...]).astype(o_ref.dtype)
        return kernel

    def kernel(x_ref, w1t_ref, w2t_ref, o_ref):
        x = x_ref[...].astype(compute_dtype)
        h = jnp.dot(x, w1t_ref[...], preferred_element_type=jnp.float32)
        h = h.astype(compute_dtype)                           # halve vreg pressure
        y = jnp.dot(h, w2t_ref[...], preferred_element_type=jnp.float32)
        o_ref[...] = y.astype(o_ref.dtype)
    return kernel


def _make_ktiled_kernel(use_bias, compute_dtype):
    """Hidden (Hp) dim tiled on the last grid axis; f32 VMEM accumulator over chunks."""
    if use_bias:
        def kernel(x_ref, w1t_ref, w2t_ref, b1_ref, b2_ref, o_ref, acc_ref):
            k = pl.program_id(1)

            @pl.when(k == 0)
            def _():
                acc_ref[...] = jnp.zeros_like(acc_ref)

            x = x_ref[...].astype(compute_dtype)
            h = jnp.dot(x, w1t_ref[...], preferred_element_type=jnp.float32)
            h = (h + b1_ref[...]).astype(compute_dtype)
            acc_ref[...] += jnp.dot(h, w2t_ref[...], preferred_element_type=jnp.float32)

            @pl.when(k == pl.num_programs(1) - 1)
            def _():
                o_ref[...] = (acc_ref[...] + b2_ref[...]).astype(o_ref.dtype)
        return kernel

    def kernel(x_ref, w1t_ref, w2t_ref, o_ref, acc_ref):
        k = pl.program_id(1)

        @pl.when(k == 0)
        def _():
            acc_ref[...] = jnp.zeros_like(acc_ref)

        x = x_ref[...].astype(compute_dtype)
        h = jnp.dot(x, w1t_ref[...], preferred_element_type=jnp.float32)
        h = h.astype(compute_dtype)
        acc_ref[...] += jnp.dot(h, w2t_ref[...], preferred_element_type=jnp.float32)

        @pl.when(k == pl.num_programs(1) - 1)
        def _():
            o_ref[...] = acc_ref[...].astype(o_ref.dtype)
    return kernel


# --------------------------------------------------------------------------------------
# Builder: one jitted forward (pad -> pallas_call -> slice) per static configuration.
# --------------------------------------------------------------------------------------
@functools.lru_cache(maxsize=None)
def _build_forward(B, D_in, H, O, Dp, Hp, Op, Bp, tile_b, tile_h,
                   x_dtype_name, compute_dtype_name, use_bias, single_buffer_weights):
    x_dtype = jnp.dtype(x_dtype_name)
    compute_dtype = jnp.dtype(compute_dtype_name)
    xsize = x_dtype.itemsize
    csize = compute_dtype.itemsize

    grid_b = _cdiv(Bp, tile_b)
    ktiled = tile_h is not None and tile_h < Hp

    # Constant-index (VMEM-resident) blocks only need a single buffer.
    wkw = {"pipeline_mode": pl.Buffered(1)} if single_buffer_weights else {}

    if not ktiled:
        kernel = _make_fused_kernel(use_bias, compute_dtype)
        grid = (grid_b,)
        in_specs = [
            pl.BlockSpec((tile_b, Dp), lambda i: (i, 0)),           # x tile (pipelined)
            pl.BlockSpec((Dp, Hp), lambda i: (0, 0), **wkw),        # W1.T resident
            pl.BlockSpec((Hp, Op), lambda i: (0, 0), **wkw),        # W2.T resident
        ]
        if use_bias:
            in_specs += [pl.BlockSpec((1, Hp), lambda i: (0, 0), **wkw),
                         pl.BlockSpec((1, Op), lambda i: (0, 0), **wkw)]
        out_specs = pl.BlockSpec((tile_b, Op), lambda i: (i, 0))
        scratch_shapes = []
        dim_sem = ("parallel",)
        wcount = 1 if single_buffer_weights else 2
        weight_bytes = (Dp * Hp + Hp * Op) * csize * wcount
        row_bytes = 2 * (Dp + Op) * xsize + 4 * (Hp + Op)
    else:
        kernel = _make_ktiled_kernel(use_bias, compute_dtype)
        grid = (grid_b, Hp // tile_h)
        in_specs = [
            pl.BlockSpec((tile_b, Dp), lambda i, k: (i, 0)),        # x tile (const over k)
            pl.BlockSpec((Dp, tile_h), lambda i, k: (0, k)),        # W1.T hidden chunk
            pl.BlockSpec((tile_h, Op), lambda i, k: (k, 0)),        # W2.T hidden chunk
        ]
        if use_bias:
            in_specs += [pl.BlockSpec((1, tile_h), lambda i, k: (0, k)),
                         pl.BlockSpec((1, Op), lambda i, k: (0, 0), **wkw)]
        out_specs = pl.BlockSpec((tile_b, Op), lambda i, k: (i, 0))
        scratch_shapes = [pltpu.VMEM((tile_b, Op), jnp.float32)]    # accumulator
        dim_sem = ("parallel", "arbitrary")
        weight_bytes = (Dp + Op) * tile_h * csize * 2               # double-buffered chunks
        row_bytes = 2 * (Dp + Op) * xsize + 4 * (tile_h + Op)

    bias_bytes = (Hp + Op) * 4 * 2 if use_bias else 0
    needed = weight_bytes + bias_bytes + tile_b * row_bytes + 2 * _MiB
    vmem_budget = int(_vmem_capacity_bytes() * 0.85)                # leave compiler headroom
    vmem_limit = int(min(max(needed, 16 * _MiB), vmem_budget))

    # Cost estimate with TRUE (unpadded) dims — scheduling hint only.
    cost = pl.CostEstimate(
        flops=2 * B * (D_in * H + H * O),
        transcendentals=0,
        bytes_accessed=(B * D_in * xsize + (D_in * H + H * O) * csize
                        + B * O * xsize + (H + O) * 4 * int(use_bias)),
    )

    call = pl.pallas_call(
        kernel,
        out_shape=jax.ShapeDtypeStruct((Bp, Op), x_dtype),
        grid=grid,
        in_specs=in_specs,
        out_specs=out_specs,
        scratch_shapes=scratch_shapes,
        compiler_params=pltpu.CompilerParams(
            dimension_semantics=dim_sem,
            vmem_limit_bytes=vmem_limit),
        cost_estimate=cost,
    )

    def fwd(x, *wargs):
        if (B, D_in) == (Bp, Dp):
            xp = x                                                  # aligned: zero-copy
        else:
            xp = jnp.zeros((Bp, Dp), x.dtype).at[:B, :D_in].set(x)
        out = call(xp, *wargs)
        if (B, O) == (Bp, Op):
            return out
        return out[:B, :O]                                          # fused into this jit

    return jax.jit(fwd)


_single_buffer_ok = True   # flipped off if this Pallas build rejects pipeline_mode/Buffered(1)


def linear_model_fa_forward(x, params, *, tile_h=None):
    """x: (B, D_in) -> (B, O), computing (x @ W1.T (+b1)) @ W2.T (+b2)."""
    global _single_buffer_ok
    D_in, H, O = params["dims"]
    w1t, w2t = params["w1t"], params["w2t"]
    Dp, Hp = w1t.shape
    Op = w2t.shape[1]
    B = x.shape[0]
    assert x.shape[1] == D_in

    x_dtype = jnp.dtype(x.dtype)
    compute_dtype = jnp.dtype(params["compute_dtype"])
    xsize, csize = x_dtype.itemsize, compute_dtype.itemsize
    use_bias = "b1" in params

    sub = _sublane_multiple(x_dtype)           # 8 for f32 x, 16 for bf16 x
    Bp = _round_up(B, sub)
    vmem_budget = int(_vmem_capacity_bytes() * 0.85)

    # ---- hidden-dim (K) tiling decision: only when resident weights would blow VMEM
    full_weight_bytes = (Dp * Hp + Hp * Op) * csize
    if tile_h is None and full_weight_bytes > vmem_budget // 3:
        budget = max(vmem_budget // 3, LANE * (Dp + Op) * csize * 2)
        tile_h = max((budget // (2 * (Dp + Op) * csize)) // LANE * LANE, LANE)
    if tile_h is not None:
        tile_h = max(min(_round_up(tile_h, LANE), Hp), LANE)
        while Hp % tile_h:                     # must divide Hp (padding beyond Hp is undefined)
            tile_h -= LANE
        if tile_h >= Hp:
            tile_h = None                      # fits in one chunk: use resident-weight path

    # ---- batch tile from the VMEM budget (instead of a fixed 512)
    if tile_h is None:
        resident = full_weight_bytes * (1 if _single_buffer_ok else 2)
        row_bytes = 2 * (Dp + Op) * xsize + 4 * (Hp + Op)
    else:
        resident = (Dp + Op) * tile_h * csize * 2
        row_bytes = 2 * (Dp + Op) * xsize + 4 * (tile_h + Op)
    avail = max(vmem_budget - resident, sub * row_bytes)
    tile_b = max((avail // row_bytes) // sub * sub, sub)
    tile_b = min(tile_b, MAX_TILE_B, Bp)
    # v7x megacore: split mid/large batches into >=2 tiles so the "parallel" batch
    # axis can occupy both TensorCores (negligible cost on single-TC v5e/v6e).
    if Bp >= 256:
        tile_b = min(tile_b, _round_up(_cdiv(Bp, 2), sub))

    args = (x, w1t, w2t) + ((params["b1"], params["b2"]) if use_bias else ())

    for single in ((True, False) if _single_buffer_ok else (False,)):
        try:
            fwd = _build_forward(B, D_in, H, O, Dp, Hp, Op, Bp, tile_b, tile_h,
                                 x_dtype.name, compute_dtype.name, use_bias, single)
            return fwd(*args)
        except Exception:
            if single:
                _single_buffer_ok = False      # retry with default double buffering
                continue
            raise
    raise AssertionError("unreachable")


if __name__ == "__main__":
    # Shapes consistent with the module: input=32, hidden=64, output=16, batch=8.
    batch, input_shape, hidden_units, output_shape = 8, 32, 64, 16

    key = jax.random.PRNGKey(0)
    kx, kw1, kw2, kb1, kb2, kx2, kw3, kw4 = jax.random.split(key, 8)

    x = jax.random.normal(kx, (batch, input_shape), dtype=jnp.float32)
    W1 = jax.random.normal(kw1, (hidden_units, input_shape), dtype=jnp.float32)
    W2 = jax.random.normal(kw2, (output_shape, hidden_units), dtype=jnp.float32)
    # TODO(synk): B1/B2 feedback matrices only affect the FA backward pass; unused in forward.

    def rel_err(y, y_ref):
        return float(jnp.linalg.norm(y - y_ref) / (jnp.linalg.norm(y_ref) + 1e-12))

    # --- no-bias (module default), f32 weights ---
    params32 = prepare_params(W1, W2, compute_dtype=jnp.float32)   # one-time prep
    y = jax.block_until_ready(linear_model_fa_forward(x, params32))
    y_ref = (x @ W1.T) @ W2.T
    assert y.shape == (batch, output_shape)
    assert rel_err(y, y_ref) < 3e-2, "mismatch (f32 weights, no bias)"

    # --- no-bias, default bf16 weights (MXU-native path) ---
    params_bf16 = prepare_params(W1, W2)
    y16 = jax.block_until_ready(linear_model_fa_forward(x, params_bf16))
    assert rel_err(y16, y_ref) < 3e-2, "mismatch (bf16 weights, no bias)"

    # --- use_bias=True path ---
    b1 = 0.1 * jax.random.normal(kb1, (hidden_units,), dtype=jnp.float32)
    b2 = 0.1 * jax.random.normal(kb2, (output_shape,), dtype=jnp.float32)
    params_b = prepare_params(W1, W2, b1, b2, compute_dtype=jnp.float32)
    yb = jax.block_until_ready(linear_model_fa_forward(x, params_b))
    yb_ref = (x @ W1.T + b1) @ W2.T + b2
    assert rel_err(yb, yb_ref) < 3e-2, "mismatch (bias)"

    # --- batch-tiled (2 tiles) + hidden(K)-tiled accumulator path ---
    B2, D2, H2, O2 = 304, 160, 256, 48
    x2 = jax.random.normal(kx2, (B2, D2), dtype=jnp.float32)
    W3 = 0.1 * jax.random.normal(kw3, (H2, D2), dtype=jnp.float32)
    W4 = 0.1 * jax.random.normal(kw4, (O2, H2), dtype=jnp.float32)
    params_k = prepare_params(W3, W4, compute_dtype=jnp.float32)
    y2 = jax.block_until_ready(linear_model_fa_forward(x2, params_k, tile_h=128))
    y2_ref = (x2 @ W3.T) @ W4.T
    assert y2.shape == (B2, O2)
    assert rel_err(y2, y2_ref) < 3e-2, "mismatch (K-tiled path)"

    print("KERNEL_OK")
</pallas_src>

<mosaic_0001>
module attributes {stable_mosaic.version = 11 : i64} {
  func.func @kernel(%arg0: i32, %arg1: memref<8x128xf32, #tpu.memory_space<vmem>>, %arg2: memref<128x128xf32, #tpu.memory_space<vmem>>, %arg3: memref<128x128xf32, #tpu.memory_space<vmem>>, %arg4: memref<8x128xf32, #tpu.memory_space<vmem>>) attributes {dimension_semantics = [#tpu.dimension_semantics<parallel>], iteration_bounds = array<i64: 1>, scalar_prefetch = 0 : i64, scratch_operands = 0 : i64, tpu.core_type = #tpu.core_type<tc>, window_params = [{transform_indices = @transform_0, window_bounds = array<i64: 8, 128>}, {pipeline_mode = #tpu.pipeline_mode<synchronous>, transform_indices = @transform_1, window_bounds = array<i64: 128, 128>}, {pipeline_mode = #tpu.pipeline_mode<synchronous>, transform_indices = @transform_2, window_bounds = array<i64: 128, 128>}, {transform_indices = @transform_3, window_bounds = array<i64: 8, 128>}]} {
    %c0 = arith.constant 0 : index
    %c0_0 = arith.constant 0 : index
    %0 = vector.load %arg1[%c0, %c0_0] : memref<8x128xf32, #tpu.memory_space<vmem>>, vector<8x128xf32>
    %c0_1 = arith.constant 0 : index
    %c0_2 = arith.constant 0 : index
    %1 = vector.load %arg2[%c0_1, %c0_2] : memref<128x128xf32, #tpu.memory_space<vmem>>, vector<128x128xf32>
    %cst = arith.constant dense<0.000000e+00> : vector<8x128xf32>
    %2 = tpu.matmul %0, %1, %cst {dimension_numbers = #tpu.dot_dimension_numbers<[1], [0], [0], [1], [0, 0, 1, 1], [], []>} : vector<8x128xf32>, vector<128x128xf32>, vector<8x128xf32> -> vector<8x128xf32>
    %c0_3 = arith.constant 0 : index
    %c0_4 = arith.constant 0 : index
    %3 = vector.load %arg3[%c0_3, %c0_4] : memref<128x128xf32, #tpu.memory_space<vmem>>, vector<128x128xf32>
    %cst_5 = arith.constant dense<0.000000e+00> : vector<8x128xf32>
    %4 = tpu.matmul %2, %3, %cst_5 {dimension_numbers = #tpu.dot_dimension_numbers<[1], [0], [0], [1], [0, 0, 1, 1], [], []>} : vector<8x128xf32>, vector<128x128xf32>, vector<8x128xf32> -> vector<8x128xf32>
    %c0_6 = arith.constant 0 : index
    %c0_7 = arith.constant 0 : index
    %5 = vector.load %arg4[%c0_6, %c0_7] : memref<8x128xf32, #tpu.memory_space<vmem>>, vector<8x128xf32>
    tpu.vector_store %arg4[%c0_6, %c0_7], %4 {strides = array<i32>} : memref<8x128xf32, #tpu.memory_space<vmem>>, vector<8x128xf32>,
    return
  }
  func.func @transform_0(%arg0: i32) -> (i32, i32) {
    %c0_i32 = arith.constant 0 : i32
    %c0_i32_0 = arith.constant 0 : i32
    return %arg0, %c0_i32 : i32, i32
  }
  func.func @transform_1(%arg0: i32) -> (i32, i32) {
    %c0_i32 = arith.constant 0 : i32
    %c0_i32_0 = arith.constant 0 : i32
    %c0_i32_1 = arith.constant 0 : i32
    return %c0_i32, %c0_i32_0 : i32, i32
  }
  func.func @transform_2(%arg0: i32) -> (i32, i32) {
    %c0_i32 = arith.constant 0 : i32
    %c0_i32_0 = arith.constant 0 : i32
    %c0_i32_1 = arith.constant 0 : i32
    return %c0_i32, %c0_i32_0 : i32, i32
  }
  func.func @transform_3(%arg0: i32) -> (i32, i32) {
    %c0_i32 = arith.constant 0 : i32
    %c0_i32_0 = arith.constant 0 : i32
    return %arg0, %c0_i32 : i32, i32
  }
}

module attributes {stable_mosaic.version = 11 : i64} {
  func.func @kernel(%arg0: i32, %arg1: memref<8x128xf32, #tpu.memory_space<vmem>>, %arg2: memref<128x128xf32, #tpu.memory_space<vmem>>, %arg3: memref<128x128xf32, #tpu.memory_space<vmem>>, %arg4: memref<8x128xf32, #tpu.memory_space<vmem>>) attributes {dimension_semantics = [#tpu.dimension_semantics<parallel>], iteration_bounds = array<i64: 1>, scalar_prefetch = 0 : i64, scratch_operands = 0 : i64, tpu.core_type = #tpu.core_type<tc>, window_params = [{transform_indices = @transform_0, window_bounds = array<i64: 8, 128>}, {pipeline_mode = #tpu.pipeline_mode<synchronous>, transform_indices = @transform_1, window_bounds = array<i64: 128, 128>}, {pipeline_mode = #tpu.pipeline_mode<synchronous>, transform_indices = @transform_2, window_bounds = array<i64: 128, 128>}, {transform_indices = @transform_3, window_bounds = array<i64: 8, 128>}]} {
    %c0 = arith.constant 0 : index
    %c0_0 = arith.constant 0 : index
    %0 = vector.load %arg1[%c0, %c0_0] : memref<8x128xf32, #tpu.memory_space<vmem>>, vector<8x128xf32>
    %c0_1 = arith.constant 0 : index
    %c0_2 = arith.constant 0 : index
    %1 = vector.load %arg2[%c0_1, %c0_2] : memref<128x128xf32, #tpu.memory_space<vmem>>, vector<128x128xf32>
    %cst = arith.constant dense<0.000000e+00> : vector<8x128xf32>
    %2 = tpu.matmul %0, %1, %cst {dimension_numbers = #tpu.dot_dimension_numbers<[1], [0], [0], [1], [0, 0, 1, 1], [], []>} : vector<8x128xf32>, vector<128x128xf32>, vector<8x128xf32> -> vector<8x128xf32>
    %c0_3 = arith.constant 0 : index
    %c0_4 = arith.constant 0 : index
    %3 = vector.load %arg3[%c0_3, %c0_4] : memref<128x128xf32, #tpu.memory_space<vmem>>, vector<128x128xf32>
    %cst_5 = arith.constant dense<0.000000e+00> : vector<8x128xf32>
    %4 = tpu.matmul %2, %3, %cst_5 {dimension_numbers = #tpu.dot_dimension_numbers<[1], [0], [0], [1], [0, 0, 1, 1], [], []>} : vector<8x128xf32>, vector<128x128xf32>, vector<8x128xf32> -> vector<8x128xf32>
    %c0_6 = arith.constant 0 : index
    %c0_7 = arith.constant 0 : index
    %5 = vector.load %arg4[%c0_6, %c0_7] : memref<8x128xf32, #tpu.memory_space<vmem>>, vector<8x128xf32>
    tpu.vector_store %arg4[%c0_6, %c0_7], %4 {strides = array<i32>} : memref<8x128xf32, #tpu.memory_space<vmem>>, vector<8x128xf32>,
    return
  }
  func.func @transform_0(%arg0: i32) -> (i32, i32) {
    %c0_i32 = arith.constant 0 : i32
    %c0_i32_0 = arith.constant 0 : i32
    return %arg0, %c0_i32 : i32, i32
  }
  func.func @transform_1(%arg0: i32) -> (i32, i32) {
    %c0_i32 = arith.constant 0 : i32
    %c0_i32_0 = arith.constant 0 : i32
    %c0_i32_1 = arith.constant 0 : i32
    return %c0_i32, %c0_i32_0 : i32, i32
  }
  func.func @transform_2(%arg0: i32) -> (i32, i32) {
    %c0_i32 = arith.constant 0 : i32
    %c0_i32_0 = arith.constant 0 : i32
    %c0_i32_1 = arith.constant 0 : i32
    return %c0_i32, %c0_i32_0 : i32, i32
  }
  func.func @transform_3(%arg0: i32) -> (i32, i32) {
    %c0_i32 = arith.constant 0 : i32
    %c0_i32_0 = arith.constant 0 : i32
    return %arg0, %c0_i32 : i32, i32
  }
}

</mosaic_0001>

<bundles_post_ra>
// kernel: fwd.1
= control target key start
LH: loop header
LB: loop body
LE: loop exit
PB: predicated region body
PF: predicated region fallthrough
CT: control target
= control target key end

     0   :  { %8 = vsyncpa [#allocation3], 0  ;;  %s548_s0 = inlined_call_operand.vmem [shape: f32[8,128], index: 0, kind: input, shape index: {}]   ;;  %s549_s1 = inlined_call_operand.hbm [shape: f32[128,128], index: 1, kind: input, shape index: {}]   ;;  %s550_s2 = inlined_call_operand.hbm [shape: f32[128,128], index: 2, kind: input, shape index: {}]   ;;  %s551_s3 = inlined_call_operand.hbm [shape: f32[8,128], index: 3, kind: output, shape index: {}]  }
   0x1   :  { %9 = vsyncpa [#allocation6], 0 }
   0x2   :  { %10 = vsyncpa [#allocation4], 0  ;;  %s465_s12 = smov [#allocation2]   ;;  %s393_s16 = scalar_lea.hbm %s549_s1, 2048 }
   0x3   :  { %s18_s13 = sshll.u32 %s465_s12, 4  ;;  %p394_p0 = scmp.ne.s32.totalorder %s549_s1, %s393_s16  ;;  %s19_s13 = int_to_ptr.vmem [resolvable:$true] %s18_s13 }
   0x4   :  { %p397_p1 = scmp.lt.u32.totalorder %s393_s16, %s549_s1 }
   0x6   :  { %p399_p2 = pnand %p397_p1, %p394_p0 }
   0x8   :  { %402 = shalt.err (!%p399_p2)
}
   0x9   :  { %s403_s21 = scalar_lea.vmem %s19_s13, 2048  ;;  %p408_p4 = scmp.lt.s32.totalorder %s19_s13, %s19_s13 }
   0xa   :  { %p404_p3 = scmp.ne.s32.totalorder %s19_s13, %s403_s21  ;;  %p409_p5 = scmp.lt.s32.totalorder %s403_s21, %s403_s21 }
   0xc   :  { %p410_p6 = por %p409_p5, %p408_p4 }
   0xe   :  { %p411_p7 = pnand %p410_p6, %p404_p3 }
  0x10   :  { %414 = shalt.err (!%p411_p7)
}
  0x11   :  { %s466_s22 = smov 128   ;;  %s467_s23 = smov 8  }
  0x12   :  { %24 = dma.hbm_to_vmem [thread:$0]  %s549_s1, 2048, %s19_s13, [#allocation3], %s466_s22, %s466_s22, %s467_s23  }
  0x13   :  { %s468_s26 = smov [#allocation5]   ;;  %s415_s30 = scalar_lea.hbm %s550_s2, 2048 }
  0x14   :  { %s30_s27 = sshll.u32 %s468_s26, 4  ;;  %p416_p8 = scmp.ne.s32.totalorder %s550_s2, %s415_s30  ;;  %s31_s27 = int_to_ptr.vmem [resolvable:$true] %s30_s27 }
  0x15   :  { %p419_p9 = scmp.lt.u32.totalorder %s415_s30, %s550_s2 }
  0x17   :  { %p421_p10 = pnand %p419_p9, %p416_p8 }
  0x19   :  { %424 = shalt.err (!%p421_p10)
}
  0x1a   :  { %s425_s8 = scalar_lea.vmem %s31_s27, 2048  ;;  %p430_p12 = scmp.lt.s32.totalorder %s31_s27, %s31_s27 }
  0x1b   :  { %p426_p11 = scmp.ne.s32.totalorder %s31_s27, %s425_s8  ;;  %p431_p13 = scmp.lt.s32.totalorder %s425_s8, %s425_s8 }
  0x1d   :  { %p432_p0 = por %p431_p13, %p430_p12 }
  0x1f   :  { %p433_p1 = pnand %p432_p0, %p426_p11 }
  0x21   :  { %436 = shalt.err (!%p433_p1)
}
  0x22   :  { %36 = dma.hbm_to_vmem [thread:$0]  %s550_s2, 2048, %s31_s27, [#allocation6], %s466_s22, %s466_s22, %s467_s23  }
  0x23   :  { %459 = dma.done.wait [#allocation3], 2048  }
  0x24   :  { %460 = vsyncadd [#allocation3], 4294965248 }
  0x25   :  { %461 = dma.done.wait [#allocation6], 2048  }
  0x26   :  { %462 = vsyncadd [#allocation6], 4294965248  ;;  %v469_v0 = vmov 0.0|0.0   ;;  %vm470_vm0 = vmmov 0   ;;  %v471_v1 = vmov 0.0   ;;  %v44_v2 = vld [vmem:[#allocation2] sm:$0xff] }
  0x27   :  { %337 = vmatprep.subr.bf16.mxu0 %v469_v0  ;;  %299 = vmatprep.mubr.msk.f32.mxu0 %vm470_vm0, %v471_v1  ;;  %v45_v3 = vld [vmem:[#allocation2 + $0x8] sm:$0xff]  ;;  %v46_v4 = vld [vmem:[#allocation2 + $0x10] sm:$0xff]  ;;  %v47_v6 = vld [vmem:[#allocation2 + $0x18] sm:$0xff]  ;;  %s472_s11 = smov [#allocation7]  }
  0x28   :  { %361 = vmatprep.subr.bf16.mxu1 %v469_v0  ;;  %334 = vmatprep.mubr.msk.f32.mxu1 %vm470_vm0, %v471_v1  ;;  %v338_v5 = vpack.c.bf16 %v45_v3, %v44_v2  ;;  %v341_v7 = vpack.c.bf16 %v47_v6, %v46_v4  ;;  %v48_v8 = vld [vmem:[#allocation2 + $0x20] sm:$0xff]  ;;  %v49_v9 = vld [vmem:[#allocation2 + $0x28] sm:$0xff]  ;;  %v132_v12 = vld [vmem:[#allocation5 + $0x10] sm:$0xff]  ;;  %s223_s12 = sshll.u32 %s472_s11, 4  ;;  %s224_s12 = int_to_ptr.vmem [resolvable:$true] %s223_s12 }
  0x29   :  { %v130_v10 = vld [vmem:[#allocation5] sm:$0xff]  ;;  %v131_v11 = vld [vmem:[#allocation5 + $0x8] sm:$0xff]  ;;  %v133_v13 = vld [vmem:[#allocation5 + $0x18] sm:$0xff]  ;;  %v344_v14 = vpack.c.bf16 %v49_v9, %v48_v8  ;;  %s437_s13 = scalar_lea.vmem %s224_s12, 128  ;;  %p442_p3 = scmp.lt.s32.totalorder %s224_s12, %s224_s12 }
  0x2a   :  { %339 = vmatpush3.bf16.msra.mxu0 %v338_v5  ;;  %v362_v15 = vpack.c.bf16 %v131_v11, %v130_v10  ;;  %v50_v16 = vld [vmem:[#allocation2 + $0x30] sm:$0xff]  ;;  %v51_v17 = vld [vmem:[#allocation2 + $0x38] sm:$0xff]  ;;  %v365_v18 = vpack.c.bf16 %v133_v13, %v132_v12  ;;  %v134_v19 = vld [vmem:[#allocation5 + $0x20] sm:$0xff]  ;;  %p438_p2 = scmp.ne.s32.totalorder %s224_s12, %s437_s13  ;;  %p443_p4 = scmp.lt.s32.totalorder %s437_s13, %s437_s13 }
  0x2b   :  { %340 = vmatprep.subr.bf16.mxu0 %v469_v0  ;;  %v135_v20 = vld [vmem:[#allocation5 + $0x28] sm:$0xff]  ;;  %v347_v21 = vpack.c.bf16 %v51_v17, %v50_v16  ;;  %v52_v22 = vld [vmem:[#allocation2 + $0x40] sm:$0xff]  ;;  %v136_v25 = vld [vmem:[#allocation5 + $0x30] sm:$0xff] }
  0x2c   :  { %363 = vmatpush3.bf16.msra.mxu1 %v362_v15  ;;  %v53_v23 = vld [vmem:[#allocation2 + $0x48] sm:$0xff]  ;;  %v368_v24 = vpack.c.bf16 %v135_v20, %v134_v19  ;;  %v137_v26 = vld [vmem:[#allocation5 + $0x38] sm:$0xff]  ;;  %v54_v28 = vld [vmem:[#allocation2 + $0x50] sm:$0xff]  ;;  %p444_p5 = por %p443_p4, %p442_p3 }
  0x2d   :  { %364 = vmatprep.subr.bf16.mxu1 %v469_v0  ;;  %v350_v27 = vpack.c.bf16 %v53_v23, %v52_v22  ;;  %v55_v29 = vld [vmem:[#allocation2 + $0x58] sm:$0xff]  ;;  %v371_v30 = vpack.c.bf16 %v137_v26, %v136_v25  ;;  %v138_v31 = vld [vmem:[#allocation5 + $0x40] sm:$0xff]  ;;  %v139_v32 = vld [vmem:[#allocation5 + $0x48] sm:$0xff] }
  0x2e   :  { %342 = vmatpush3.bf16.msra.mxu0 %v341_v7  ;;  %v353_v33 = vpack.c.bf16 %v55_v29, %v54_v28  ;;  %v56_v34 = vld [vmem:[#allocation2 + $0x60] sm:$0xff]  ;;  %v57_v35 = vld [vmem:[#allocation2 + $0x68] sm:$0xff]  ;;  %v374_v36 = vpack.c.bf16 %v139_v32, %v138_v31  ;;  %v140_v37 = vld [vmem:[#allocation5 + $0x50] sm:$0xff]  ;;  %p445_p6 = pnand %p444_p5, %p438_p2 }
  0x2f   :  { %343 = vmatprep.subr.bf16.mxu0 %v469_v0  ;;  %v141_v38 = vld [vmem:[#allocation5 + $0x58] sm:$0xff]  ;;  %v356_v39 = vpack.c.bf16 %v57_v35, %v56_v34  ;;  %v58_v40 = vld [vmem:[#allocation2 + $0x70] sm:$0xff]  ;;  %v142_v43 = vld [vmem:[#allocation5 + $0x60] sm:$0xff] }
  0x30   :  { %366 = vmatpush3.bf16.msra.mxu1 %v365_v18  ;;  %v59_v41 = vld [vmem:[#allocation2 + $0x78] sm:$0xff]  ;;  %v377_v42 = vpack.c.bf16 %v141_v38, %v140_v37  ;;  %v143_v44 = vld [vmem:[#allocation5 + $0x68] sm:$0xff]  ;;  %v144_v47 = vld [vmem:[#allocation5 + $0x70] sm:$0xff] }
  0x31   :  { %367 = vmatprep.subr.bf16.mxu1 %v469_v0  ;;  %v359_v45 = vpack.c.bf16 %v59_v41, %v58_v40  ;;  %v380_v46 = vpack.c.bf16 %v143_v44, %v142_v43  ;;  %v145_v48 = vld [vmem:[#allocation5 + $0x78] sm:$0xff]  ;;  %v43_v49 = vld [vmem:[%s548_s0] sm:$0xff] }
  0x32   :  { %345 = vmatpush3.bf16.msra.mxu0 %v344_v14  ;;  %v383_v50 = vpack.c.bf16 %v145_v48, %v144_v47 }
  0x33   :  { %346 = vmatprep.subr.bf16.mxu0 %v469_v0 }
  0x34   :  { %369 = vmatpush3.bf16.msra.mxu1 %v368_v24 }
  0x35   :  { %370 = vmatprep.subr.bf16.mxu1 %v469_v0 }
  0x36   :  { %348 = vmatpush3.bf16.msra.mxu0 %v347_v21 }
  0x37   :  { %349 = vmatprep.subr.bf16.mxu0 %v469_v0 }
  0x38   :  { %372 = vmatpush3.bf16.msra.mxu1 %v371_v30 }
  0x39   :  { %373 = vmatprep.subr.bf16.mxu1 %v469_v0 }
  0x3a   :  { %351 = vmatpush3.bf16.msra.mxu0 %v350_v27 }
  0x3b   :  { %352 = vmatprep.subr.bf16.mxu0 %v469_v0 }
  0x3c   :  { %375 = vmatpush3.bf16.msra.mxu1 %v374_v36 }
  0x3d   :  { %376 = vmatprep.subr.bf16.mxu1 %v469_v0 }
  0x3e   :  { %354 = vmatpush3.bf16.msra.mxu0 %v353_v33 }
  0x3f   :  { %355 = vmatprep.subr.bf16.mxu0 %v469_v0 }
  0x40   :  { %378 = vmatpush3.bf16.msra.mxu1 %v377_v42 }
  0x41   :  { %379 = vmatprep.subr.bf16.mxu1 %v469_v0 }
  0x42   :  { %357 = vmatpush3.bf16.msra.mxu0 %v356_v39 }
  0x43   :  { %358 = vmatprep.subr.bf16.mxu0 %v469_v0 }
  0x44   :  { %381 = vmatpush3.bf16.msra.mxu1 %v380_v46 }
  0x45   :  { %382 = vmatprep.subr.bf16.mxu1 %v469_v0 }
  0x46   :  { %360 = vmatpush3.bf16.msra.mxu0 %v359_v45 }
  0x48   :  { %384 = vmatpush3.bf16.msra.mxu1 %v383_v50 }
  0x49   :  { %300 = vmatmul.mubr.f32.vlgmr.msra.gmra.mrb[0].mxu0 %v43_v49 }
 0x11c   :  { %v126_v51 = vpop.f32.mrb[0].mxu0 }
 0x11d   :  { %v301_v52 = vpop.f32.mrb[1].mxu0  ;;  %335 = vmatmul.mubr.f32.vlgmr.msra.gmra.mrb[0].mxu1 %v126_v51 }
 0x1f0   :  { %v212_v53 = vpop.f32.mrb[0].mxu1 }
 0x1f1   :  { %216 = vst [vmem:[#allocation7] sm:$0xff] %v212_v53  ;;  %v336_v54 = vpop.f32.mrb[1].mxu1 }
 0x1f2   :  { %448 = shalt.err (!%p445_p6)
}
 0x1f3   :  { %s449_s15 = scalar_lea.hbm %s551_s3, 128 }
 0x1f4   :  { %p450_p7 = scmp.ne.s32.totalorder %s551_s3, %s449_s15  ;;  %p453_p8 = scmp.lt.u32.totalorder %s449_s15, %s551_s3 }
 0x1f6   :  { %p455_p9 = pnand %p453_p8, %p450_p7 }
 0x1f8   :  { %458 = shalt.err (!%p455_p9)
}
 0x1f9   :  { %226 = dma.vmem_to_hbm [thread:$0]  %s224_s12, 128, %s551_s3, [#allocation4]  }
 0x1fa   :  { %463 = dma.done.wait [#allocation4], 128  }
 0x1fb   :  { %464 = vsyncadd [#allocation4], 4294967168 }
 0x1fc   :  { %230 = vsyncpa [#allocation3], 1 }
 0x1fd   :  { %231 = vsyncpa [#allocation6], 1 }
 0x1fe   :  { %232 = vsyncpa [#allocation4], 1 }

// kernel: fwd.1
= control target key start
LH: loop header
LB: loop body
LE: loop exit
PB: predicated region body
PF: predicated region fallthrough
CT: control target
= control target key end

     0   :  { %8 = vsyncpa [#allocation3], 0  ;;  %s548_s0 = inlined_call_operand.vmem [shape: f32[8,128], index: 0, kind: input, shape index: {}]   ;;  %s549_s1 = inlined_call_operand.hbm [shape: f32[128,128], index: 1, kind: input, shape index: {}]   ;;  %s550_s2 = inlined_call_operand.hbm [shape: f32[128,128], index: 2, kind: input, shape index: {}]   ;;  %s551_s3 = inlined_call_operand.hbm [shape: f32[8,128], index: 3, kind: output, shape index: {}]  }
   0x1   :  { %9 = vsyncpa [#allocation6], 0 }
   0x2   :  { %10 = vsyncpa [#allocation4], 0  ;;  %s465_s12 = smov [#allocation2]   ;;  %s393_s16 = scalar_lea.hbm %s549_s1, 2048 }
   0x3   :  { %s18_s13 = sshll.u32 %s465_s12, 4  ;;  %p394_p0 = scmp.ne.s32.totalorder %s549_s1, %s393_s16  ;;  %s19_s13 = int_to_ptr.vmem [resolvable:$true] %s18_s13 }
   0x4   :  { %p397_p1 = scmp.lt.u32.totalorder %s393_s16, %s549_s1 }
   0x6   :  { %p399_p2 = pnand %p397_p1, %p394_p0 }
   0x8   :  { %402 = shalt.err (!%p399_p2)
}
   0x9   :  { %s403_s21 = scalar_lea.vmem %s19_s13, 2048  ;;  %p408_p4 = scmp.lt.s32.totalorder %s19_s13, %s19_s13 }
   0xa   :  { %p404_p3 = scmp.ne.s32.totalorder %s19_s13, %s403_s21  ;;  %p409_p5 = scmp.lt.s32.totalorder %s403_s21, %s403_s21 }
   0xc   :  { %p410_p6 = por %p409_p5, %p408_p4 }
   0xe   :  { %p411_p7 = pnand %p410_p6, %p404_p3 }
  0x10   :  { %414 = shalt.err (!%p411_p7)
}
  0x11   :  { %s466_s22 = smov 128   ;;  %s467_s23 = smov 8  }
  0x12   :  { %24 = dma.hbm_to_vmem [thread:$0]  %s549_s1, 2048, %s19_s13, [#allocation3], %s466_s22, %s466_s22, %s467_s23  }
  0x13   :  { %s468_s26 = smov [#allocation5]   ;;  %s415_s30 = scalar_lea.hbm %s550_s2, 2048 }
  0x14   :  { %s30_s27 = sshll.u32 %s468_s26, 4  ;;  %p416_p8 = scmp.ne.s32.totalorder %s550_s2, %s415_s30  ;;  %s31_s27 = int_to_ptr.vmem [resolvable:$true] %s30_s27 }
  0x15   :  { %p419_p9 = scmp.lt.u32.totalorder %s415_s30, %s550_s2 }
  0x17   :  { %p421_p10 = pnand %p419_p9, %p416_p8 }
  0x19   :  { %424 = shalt.err (!%p421_p10)
}
  0x1a   :  { %s425_s8 = scalar_lea.vmem %s31_s27, 2048  ;;  %p430_p12 = scmp.lt.s32.totalorder %s31_s27, %s31_s27 }
  0x1b   :  { %p426_p11 = scmp.ne.s32.totalorder %s31_s27, %s425_s8  ;;  %p431_p13 = scmp.lt.s32.totalorder %s425_s8, %s425_s8 }
  0x1d   :  { %p432_p0 = por %p431_p13, %p430_p12 }
  0x1f   :  { %p433_p1 = pnand %p432_p0, %p426_p11 }
  0x21   :  { %436 = shalt.err (!%p433_p1)
}
  0x22   :  { %36 = dma.hbm_to_vmem [thread:$0]  %s550_s2, 2048, %s31_s27, [#allocation6], %s466_s22, %s466_s22, %s467_s23  }
  0x23   :  { %459 = dma.done.wait [#allocation3], 2048  }
  0x24   :  { %460 = vsyncadd [#allocation3], 4294965248 }
  0x25   :  { %461 = dma.done.wait [#allocation6], 2048  }
  0x26   :  { %462 = vsyncadd [#allocation6], 4294965248  ;;  %v469_v0 = vmov 0.0|0.0   ;;  %vm470_vm0 = vmmov 0   ;;  %v471_v1 = vmov 0.0   ;;  %v44_v2 = vld [vmem:[#allocation2] sm:$0xff] }
  0x27   :  { %337 = vmatprep.subr.bf16.mxu0 %v469_v0  ;;  %299 = vmatprep.mubr.msk.f32.mxu0 %vm470_vm0, %v471_v1  ;;  %v45_v3 = vld [vmem:[#allocation2 + $0x8] sm:$0xff]  ;;  %v46_v4 = vld [vmem:[#allocation2 + $0x10] sm:$0xff]  ;;  %v47_v6 = vld [vmem:[#allocation2 + $0x18] sm:$0xff]  ;;  %s472_s11 = smov [#allocation7]  }
  0x28   :  { %361 = vmatprep.subr.bf16.mxu1 %v469_v0  ;;  %334 = vmatprep.mubr.msk.f32.mxu1 %vm470_vm0, %v471_v1  ;;  %v338_v5 = vpack.c.bf16 %v45_v3, %v44_v2  ;;  %v341_v7 = vpack.c.bf16 %v47_v6, %v46_v4  ;;  %v48_v8 = vld [vmem:[#allocation2 + $0x20] sm:$0xff]  ;;  %v49_v9 = vld [vmem:[#allocation2 + $0x28] sm:$0xff]  ;;  %v132_v12 = vld [vmem:[#allocation5 + $0x10] sm:$0xff]  ;;  %s223_s12 = sshll.u32 %s472_s11, 4  ;;  %s224_s12 = int_to_ptr.vmem [resolvable:$true] %s223_s12 }
  0x29   :  { %v130_v10 = vld [vmem:[#allocation5] sm:$0xff]  ;;  %v131_v11 = vld [vmem:[#allocation5 + $0x8] sm:$0xff]  ;;  %v133_v13 = vld [vmem:[#allocation5 + $0x18] sm:$0xff]  ;;  %v344_v14 = vpack.c.bf16 %v49_v9, %v48_v8  ;;  %s437_s13 = scalar_lea.vmem %s224_s12, 128  ;;  %p442_p3 = scmp.lt.s32.totalorder %s224_s12, %s224_s12 }
  0x2a   :  { %339 = vmatpush3.bf16.msra.mxu0 %v338_v5  ;;  %v362_v15 = vpack.c.bf16 %v131_v11, %v130_v10  ;;  %v50_v16 = vld [vmem:[#allocation2 + $0x30] sm:$0xff]  ;;  %v51_v17 = vld [vmem:[#allocation2 + $0x38] sm:$0xff]  ;;  %v365_v18 = vpack.c.bf16 %v133_v13, %v132_v12  ;;  %v134_v19 = vld [vmem:[#allocation5 + $0x20] sm:$0xff]  ;;  %p438_p2 = scmp.ne.s32.totalorder %s224_s12, %s437_s13  ;;  %p443_p4 = scmp.lt.s32.totalorder %s437_s13, %s437_s13 }
  0x2b   :  { %340 = vmatprep.subr.bf16.mxu0 %v469_v0  ;;  %v135_v20 = vld [vmem:[#allocation5 + $0x28] sm:$0xff]  ;;  %v347_v21 = vpack.c.bf16 %v51_v17, %v50_v16  ;;  %v52_v22 = vld [vmem:[#allocation2 + $0x40] sm:$0xff]  ;;  %v136_v25 = vld [vmem:[#allocation5 + $0x30] sm:$0xff] }
  0x2c   :  { %363 = vmatpush3.bf16.msra.mxu1 %v362_v15  ;;  %v53_v23 = vld [vmem:[#allocation2 + $0x48] sm:$0xff]  ;;  %v368_v24 = vpack.c.bf16 %v135_v20, %v134_v19  ;;  %v137_v26 = vld [vmem:[#allocation5 + $0x38] sm:$0xff]  ;;  %v54_v28 = vld [vmem:[#allocation2 + $0x50] sm:$0xff]  ;;  %p444_p5 = por %p443_p4, %p442_p3 }
  0x2d   :  { %364 = vmatprep.subr.bf16.mxu1 %v469_v0  ;;  %v350_v27 = vpack.c.bf16 %v53_v23, %v52_v22  ;;  %v55_v29 = vld [vmem:[#allocation2 + $0x58] sm:$0xff]  ;;  %v371_v30 = vpack.c.bf16 %v137_v26, %v136_v25  ;;  %v138_v31 = vld [vmem:[#allocation5 + $0x40] sm:$0xff]  ;;  %v139_v32 = vld [vmem:[#allocation5 + $0x48] sm:$0xff] }
  0x2e   :  { %342 = vmatpush3.bf16.msra.mxu0 %v341_v7  ;;  %v353_v33 = vpack.c.bf16 %v55_v29, %v54_v28  ;;  %v56_v34 = vld [vmem:[#allocation2 + $0x60] sm:$0xff]  ;;  %v57_v35 = vld [vmem:[#allocation2 + $0x68] sm:$0xff]  ;;  %v374_v36 = vpack.c.bf16 %v139_v32, %v138_v31  ;;  %v140_v37 = vld [vmem:[#allocation5 + $0x50] sm:$0xff]  ;;  %p445_p6 = pnand %p444_p5, %p438_p2 }
  0x2f   :  { %343 = vmatprep.subr.bf16.mxu0 %v469_v0  ;;  %v141_v38 = vld [vmem:[#allocation5 + $0x58] sm:$0xff]  ;;  %v356_v39 = vpack.c.bf16 %v57_v35, %v56_v34  ;;  %v58_v40 = vld [vmem:[#allocation2 + $0x70] sm:$0xff]  ;;  %v142_v43 = vld [vmem:[#allocation5 + $0x60] sm:$0xff] }
  0x30   :  { %366 = vmatpush3.bf16.msra.mxu1 %v365_v18  ;;  %v59_v41 = vld [vmem:[#allocation2 + $0x78] sm:$0xff]  ;;  %v377_v42 = vpack.c.bf16 %v141_v38, %v140_v37  ;;  %v143_v44 = vld [vmem:[#allocation5 + $0x68] sm:$0xff]  ;;  %v144_v47 = vld [vmem:[#allocation5 + $0x70] sm:$0xff] }
  0x31   :  { %367 = vmatprep.subr.bf16.mxu1 %v469_v0  ;;  %v359_v45 = vpack.c.bf16 %v59_v41, %v58_v40  ;;  %v380_v46 = vpack.c.bf16 %v143_v44, %v142_v43  ;;  %v145_v48 = vld [vmem:[#allocation5 + $0x78] sm:$0xff]  ;;  %v43_v49 = vld [vmem:[%s548_s0] sm:$0xff] }
  0x32   :  { %345 = vmatpush3.bf16.msra.mxu0 %v344_v14  ;;  %v383_v50 = vpack.c.bf16 %v145_v48, %v144_v47 }
  0x33   :  { %346 = vmatprep.subr.bf16.mxu0 %v469_v0 }
  0x34   :  { %369 = vmatpush3.bf16.msra.mxu1 %v368_v24 }
  0x35   :  { %370 = vmatprep.subr.bf16.mxu1 %v469_v0 }
  0x36   :  { %348 = vmatpush3.bf16.msra.mxu0 %v347_v21 }
  0x37   :  { %349 = vmatprep.subr.bf16.mxu0 %v469_v0 }
  0x38   :  { %372 = vmatpush3.bf16.msra.mxu1 %v371_v30 }
  0x39   :  { %373 = vmatprep.subr.bf16.mxu1 %v469_v0 }
  0x3a   :  { %351 = vmatpush3.bf16.msra.mxu0 %v350_v27 }
  0x3b   :  { %352 = vmatprep.subr.bf16.mxu0 %v469_v0 }
  0x3c   :  { %375 = vmatpush3.bf16.msra.mxu1 %v374_v36 }
  0x3d   :  { %376 = vmatprep.subr.bf16.mxu1 %v469_v0 }
  0x3e   :  { %354 = vmatpush3.bf16.msra.mxu0 %v353_v33 }
  0x3f   :  { %355 = vmatprep.subr.bf16.mxu0 %v469_v0 }
  0x40   :  { %378 = vmatpush3.bf16.msra.mxu1 %v377_v42 }
  0x41   :  { %379 = vmatprep.subr.bf16.mxu1 %v469_v0 }
  0x42   :  { %357 = vmatpush3.bf16.msra.mxu0 %v356_v39 }
  0x43   :  { %358 = vmatprep.subr.bf16.mxu0 %v469_v0 }
  0x44   :  { %381 = vmatpush3.bf16.msra.mxu1 %v380_v46 }
  0x45   :  { %382 = vmatprep.subr.bf16.mxu1 %v469_v0 }
  0x46   :  { %360 = vmatpush3.bf16.msra.mxu0 %v359_v45 }
  0x48   :  { %384 = vmatpush3.bf16.msra.mxu1 %v383_v50 }
  0x49   :  { %300 = vmatmul.mubr.f32.vlgmr.msra.gmra.mrb[0].mxu0 %v43_v49 }
 0x11c   :  { %v126_v51 = vpop.f32.mrb[0].mxu0 }
 0x11d   :  { %v301_v52 = vpop.f32.mrb[1].mxu0  ;;  %335 = vmatmul.mubr.f32.vlgmr.msra.gmra.mrb[0].mxu1 %v126_v51 }
 0x1f0   :  { %v212_v53 = vpop.f32.mrb[0].mxu1 }
 0x1f1   :  { %216 = vst [vmem:[#allocation7] sm:$0xff] %v212_v53  ;;  %v336_v54 = vpop.f32.mrb[1].mxu1 }
 0x1f2   :  { %448 = shalt.err (!%p445_p6)
}
 0x1f3   :  { %s449_s15 = scalar_lea.hbm %s551_s3, 128 }
 0x1f4   :  { %p450_p7 = scmp.ne.s32.totalorder %s551_s3, %s449_s15  ;;  %p453_p8 = scmp.lt.u32.totalorder %s449_s15, %s551_s3 }
 0x1f6   :  { %p455_p9 = pnand %p453_p8, %p450_p7 }
 0x1f8   :  { %458 = shalt.err (!%p455_p9)
}
 0x1f9   :  { %226 = dma.vmem_to_hbm [thread:$0]  %s224_s12, 128, %s551_s3, [#allocation4]  }
 0x1fa   :  { %463 = dma.done.wait [#allocation4], 128  }
 0x1fb   :  { %464 = vsyncadd [#allocation4], 4294967168 }
 0x1fc   :  { %230 = vsyncpa [#allocation3], 1 }
 0x1fd   :  { %231 = vsyncpa [#allocation6], 1 }
 0x1fe   :  { %232 = vsyncpa [#allocation4], 1 }

</bundles_post_ra>
